<compile_context>
chip_gen: v7x
topology: tpu7x:2x2x1
jax: 0.10.0
libtpu: 0.0.40
codegen_flags: <defaults>
</compile_context>

<pallas_src>
import jax
import jax.numpy as jnp
from jax.experimental import pallas as pl
from jax.experimental.pallas import tpu as pltpu

B = 2
H = W = 32
CIN = 1
COUT = 6
K = 3
CONV = H - K + 1            # 30 (valid conv output size)
POOL = CONV // 2            # 15 (pooled output size)
LANES = POOL * COUT         # 90  lane index l = j*6 + oc (pooled col j, channel oc)
NSLAB = 2 * (K + 1)         # 8   slab index s = dw*2 + row_parity, dw in [0,4)
SLAB_ROWS = POOL + 1        # 16  pooled-row slots (i + dh//2, dh//2 in {0,1})
FC_IN = COUT * POOL * POOL  # 1350
FC_OUT = 10


def net_kernel(x_ref, wv9_ref, bvec_ref, wfcp_ref, bfc_ref, out_ref):
    # x_ref:   (1, 8, 16, 90)  pre-shifted parity slabs of one image:
    #          x_ref[0, dw*2+pr, i, j*6+oc] == x[2*i + pr, 2*j + dw]
    # wv9_ref: (9, 90)      conv tap weights, lane value = W[oc=l%6, kh, kw]
    # bvec_ref:(1, 90)      conv bias per lane
    # wfcp_ref:(15, 10, 90) FC weight at pool-anchor granularity
    # bfc_ref: (1, 10)
    # out_ref: (1, 1, 10)
    # Hoisted loads: 9 tap rows (<= 9 vregs) + bias, reused by every update.
    w_taps = [wv9_ref[t, :] for t in range(K * K)]
    bias = bvec_ref[0, :]

    # ---- conv accumulation at pooled granularity --------------------------
    # accs[a][b2][i, j*6+oc] accumulates conv(pre-bias)[oc, 2i+a, 2j+b2].
    accs = [[jnp.zeros((POOL, LANES), jnp.float32) for _ in range(2)]
            for _ in range(2)]
    for dh in range(K + 1):
        for dw in range(K + 1):
            # One lane-aligned (15, 90) slice, consumed immediately by the
            # (<= 4) accumulators that need it -- no large live set.
            xs = x_ref[0, dw * 2 + (dh % 2), pl.ds(dh // 2, POOL), :]
            for a in range(2):
                kh = dh - a
                if not (0 <= kh < K):
                    continue
                for b2 in range(2):
                    kw = dw - b2
                    if not (0 <= kw < K):
                        continue
                    accs[a][b2] = accs[a][b2] + xs * w_taps[kh * K + kw]

    # ---- bias + ReLU + 2x2 max-pool (second ReLU is a no-op on >=0 data) --
    m = None
    for a in range(2):
        for b2 in range(2):
            v = jnp.maximum(accs[a][b2] + bias, 0.0)
            m = v if m is None else jnp.maximum(m, v)
    # m[i, j*6+oc] == max_pool2d(relu(conv(x)))[oc, i, j]

    # ---- FC: out[o] = sum_{i,l} m[i,l] * wfcp[i,o,l] + bfc[o] --------------
    part = jnp.zeros((FC_OUT, LANES), jnp.float32)
    for i in range(POOL):
        part = part + m[i, :] * wfcp_ref[i]          # (10, 90), 2 vregs
    res = jnp.sum(part, axis=1) + bfc_ref[0, :]      # (10,)
    out_ref[0, 0, :] = res


def prepare_params(wconv, bconv, wfc, bfc):
    """One-time weight preprocessing (hoisted out of the forward path)."""
    wc = wconv.reshape(COUT, K * K).astype(jnp.float32)          # [oc, kh*3+kw]
    # Lane-blocked conv tap weights / bias: value at lane j*6+oc is W[oc,kh,kw].
    wv9 = jnp.tile(wc.T, (1, POOL))                              # (9, 90)
    bvec = jnp.tile(bconv.astype(jnp.float32).reshape(1, COUT), (1, POOL))  # (1, 90)
    # Compact FC weight: pool-anchor rows only, lane index j*6+oc.
    wfc_r = wfc.reshape(FC_OUT, COUT, POOL, POOL).astype(jnp.float32)       # [o,oc,i,j]
    wfcp = jnp.transpose(wfc_r, (2, 0, 3, 1)).reshape(POOL, FC_OUT, LANES)  # [i,o,l]
    bfc2 = bfc.astype(jnp.float32).reshape(1, FC_OUT)
    return wv9, bvec, wfcp, bfc2


@jax.jit
def net_forward(x_nchw, wv9, bvec, wfcp, bfc2):
    # Layout plumbing only (8 KB input): build the 8 pre-shifted parity slabs
    #   xslab[b, dw*2+pr, i, j*6+oc] = x[b, 2*i+pr, 2*j+dw]
    xi = x_nchw.reshape(B, H, W).astype(jnp.float32)
    slabs = []
    for dw in range(K + 1):
        for pr in range(2):
            sl = xi[:, pr::2, dw:dw + 2 * POOL - 1:2]        # (B, 16, 15)
            slabs.append(jnp.repeat(sl, COUT, axis=2))       # (B, 16, 90)
    xslab = jnp.stack(slabs, axis=1)                         # (B, 8, 16, 90)

    grid_spec = pltpu.PrefetchScalarGridSpec(
        num_scalar_prefetch=0,
        grid=(B,),   # one image per grid step; parallel across TCs on v7x
        in_specs=[
            pl.BlockSpec((1, NSLAB, SLAB_ROWS, LANES), lambda b: (b, 0, 0, 0)),
            pl.BlockSpec((K * K, LANES), lambda b: (0, 0)),           # wv9
            pl.BlockSpec((1, LANES), lambda b: (0, 0)),               # bvec
            pl.BlockSpec((POOL, FC_OUT, LANES), lambda b: (0, 0, 0)),  # wfcp
            pl.BlockSpec((1, FC_OUT), lambda b: (0, 0)),              # bfc
        ],
        out_specs=pl.BlockSpec((1, 1, FC_OUT), lambda b: (b, 0, 0)),
    )
    out = pl.pallas_call(
        net_kernel,
        out_shape=jax.ShapeDtypeStruct((B, 1, FC_OUT), jnp.float32),
        grid_spec=grid_spec,
        compiler_params=pltpu.CompilerParams(
            dimension_semantics=("parallel",)),
    )(xslab, wv9, bvec, wfcp, bfc2)
    return out.reshape(B, FC_OUT)


def reference(x_nchw, wconv, bconv, wfc, bfc):
    y = jax.lax.conv_general_dilated(
        x_nchw, wconv, window_strides=(1, 1), padding="VALID",
        dimension_numbers=("NCHW", "OIHW", "NCHW"))
    y = y + bconv.reshape(1, COUT, 1, 1)
    y = jnp.maximum(y, 0.0)
    y = jax.lax.reduce_window(y, -jnp.inf, jax.lax.max,
                              (1, 1, 2, 2), (1, 1, 2, 2), "VALID")
    y = jnp.maximum(y, 0.0)
    y = y.reshape(B, -1)
    return y @ wfc.T + bfc


if __name__ == "__main__":
    key = jax.random.PRNGKey(0)
    k1, k2, k3, k4, k5 = jax.random.split(key, 5)
    wconv = jax.random.normal(k1, (COUT, CIN, K, K), jnp.float32) * 0.1
    bconv = jax.random.normal(k2, (COUT,), jnp.float32) * 0.1
    wfc = jax.random.normal(k3, (FC_OUT, FC_IN), jnp.float32) * 0.02
    bfc = jax.random.normal(k4, (FC_OUT,), jnp.float32) * 0.02
    x = jax.random.normal(k5, (B, CIN, H, W), jnp.float32)

    # Weight preprocessing runs once, outside the forward path.
    params = jax.block_until_ready(prepare_params(wconv, bconv, wfc, bfc))

    out = jax.block_until_ready(net_forward(x, *params))

    ref = jax.block_until_ready(reference(x, wconv, bconv, wfc, bfc))
    assert out.shape == (B, FC_OUT)
    assert jnp.allclose(out, ref, atol=1e-3, rtol=1e-3), (out, ref)

    print("KERNEL_OK")
</pallas_src>

<mosaic_0001>
module attributes {stable_mosaic.version = 11 : i64} {
  func.func @net_kernel(%arg0: i32, %arg1: memref<1x8x16x90xf32, #tpu.memory_space<vmem>>, %arg2: memref<9x90xf32, #tpu.memory_space<vmem>>, %arg3: memref<1x90xf32, #tpu.memory_space<vmem>>, %arg4: memref<15x10x90xf32, #tpu.memory_space<vmem>>, %arg5: memref<1x10xf32, #tpu.memory_space<vmem>>, %arg6: memref<1x1x10xf32, #tpu.memory_space<vmem>>) attributes {dimension_semantics = [#tpu.dimension_semantics<parallel>], iteration_bounds = array<i64: 2>, scalar_prefetch = 0 : i64, scratch_operands = 0 : i64, tpu.core_type = #tpu.core_type<tc>, window_params = [{transform_indices = @transform_0, window_bounds = array<i64: 1, 8, 16, 90>}, {pipeline_mode = #tpu.pipeline_mode<synchronous>, transform_indices = @transform_1, window_bounds = array<i64: 9, 90>}, {pipeline_mode = #tpu.pipeline_mode<synchronous>, transform_indices = @transform_2, window_bounds = array<i64: 1, 90>}, {pipeline_mode = #tpu.pipeline_mode<synchronous>, transform_indices = @transform_3, window_bounds = array<i64: 15, 10, 90>}, {pipeline_mode = #tpu.pipeline_mode<synchronous>, transform_indices = @transform_4, window_bounds = array<i64: 1, 10>}, {transform_indices = @transform_5, window_bounds = array<i64: 1, 1, 10>}]} {
    %c0 = arith.constant 0 : index
    %c0_0 = arith.constant 0 : index
    %0 = vector.load %arg2[%c0, %c0_0] : memref<9x90xf32, #tpu.memory_space<vmem>>, vector<1x90xf32>
    %1 = vector.shape_cast %0 : vector<1x90xf32> to vector<90xf32>
    %c1 = arith.constant 1 : index
    %c0_1 = arith.constant 0 : index
    %2 = vector.load %arg2[%c1, %c0_1] : memref<9x90xf32, #tpu.memory_space<vmem>>, vector<1x90xf32>
    %3 = vector.shape_cast %2 : vector<1x90xf32> to vector<90xf32>
    %c2 = arith.constant 2 : index
    %c0_2 = arith.constant 0 : index
    %4 = vector.load %arg2[%c2, %c0_2] : memref<9x90xf32, #tpu.memory_space<vmem>>, vector<1x90xf32>
    %5 = vector.shape_cast %4 : vector<1x90xf32> to vector<90xf32>
    %c3 = arith.constant 3 : index
    %c0_3 = arith.constant 0 : index
    %6 = vector.load %arg2[%c3, %c0_3] : memref<9x90xf32, #tpu.memory_space<vmem>>, vector<1x90xf32>
    %7 = vector.shape_cast %6 : vector<1x90xf32> to vector<90xf32>
    %c4 = arith.constant 4 : index
    %c0_4 = arith.constant 0 : index
    %8 = vector.load %arg2[%c4, %c0_4] : memref<9x90xf32, #tpu.memory_space<vmem>>, vector<1x90xf32>
    %9 = vector.shape_cast %8 : vector<1x90xf32> to vector<90xf32>
    %c5 = arith.constant 5 : index
    %c0_5 = arith.constant 0 : index
    %10 = vector.load %arg2[%c5, %c0_5] : memref<9x90xf32, #tpu.memory_space<vmem>>, vector<1x90xf32>
    %11 = vector.shape_cast %10 : vector<1x90xf32> to vector<90xf32>
    %c6 = arith.constant 6 : index
    %c0_6 = arith.constant 0 : index
    %12 = vector.load %arg2[%c6, %c0_6] : memref<9x90xf32, #tpu.memory_space<vmem>>, vector<1x90xf32>
    %13 = vector.shape_cast %12 : vector<1x90xf32> to vector<90xf32>
    %c7 = arith.constant 7 : index
    %c0_7 = arith.constant 0 : index
    %14 = vector.load %arg2[%c7, %c0_7] : memref<9x90xf32, #tpu.memory_space<vmem>>, vector<1x90xf32>
    %15 = vector.shape_cast %14 : vector<1x90xf32> to vector<90xf32>
    %c8 = arith.constant 8 : index
    %c0_8 = arith.constant 0 : index
    %16 = vector.load %arg2[%c8, %c0_8] : memref<9x90xf32, #tpu.memory_space<vmem>>, vector<1x90xf32>
    %17 = vector.shape_cast %16 : vector<1x90xf32> to vector<90xf32>
    %c0_9 = arith.constant 0 : index
    %c0_10 = arith.constant 0 : index
    %18 = vector.load %arg3[%c0_9, %c0_10] : memref<1x90xf32, #tpu.memory_space<vmem>>, vector<1x90xf32>
    %19 = vector.shape_cast %18 : vector<1x90xf32> to vector<90xf32>
    %cst = arith.constant 0.000000e+00 : f32
    %20 = vector.broadcast %cst : f32 to vector<15x90xf32>
    %cst_11 = arith.constant 0.000000e+00 : f32
    %21 = vector.broadcast %cst_11 : f32 to vector<15x90xf32>
    %cst_12 = arith.constant 0.000000e+00 : f32
    %22 = vector.broadcast %cst_12 : f32 to vector<15x90xf32>
    %cst_13 = arith.constant 0.000000e+00 : f32
    %23 = vector.broadcast %cst_13 : f32 to vector<15x90xf32>
    %c0_14 = arith.constant 0 : index
    %c0_15 = arith.constant 0 : index
    %c0_16 = arith.constant 0 : index
    %c0_17 = arith.constant 0 : index
    %24 = vector.load %arg1[%c0_14, %c0_15, %c0_16, %c0_17] : memref<1x8x16x90xf32, #tpu.memory_space<vmem>>, vector<1x1x15x90xf32>
    %25 = vector.shape_cast %24 : vector<1x1x15x90xf32> to vector<15x90xf32>
    %26 = vector.shape_cast %1 : vector<90xf32> to vector<1x90xf32>
    %27 = vector.broadcast %26 : vector<1x90xf32> to vector<15x90xf32>
    %28 = arith.mulf %25, %27 : vector<15x90xf32>
    %29 = arith.addf %20, %28 : vector<15x90xf32>
    %c0_18 = arith.constant 0 : index
    %c2_19 = arith.constant 2 : index
    %c0_20 = arith.constant 0 : index
    %c0_21 = arith.constant 0 : index
    %30 = vector.load %arg1[%c0_18, %c2_19, %c0_20, %c0_21] : memref<1x8x16x90xf32, #tpu.memory_space<vmem>>, vector<1x1x15x90xf32>
    %31 = vector.shape_cast %30 : vector<1x1x15x90xf32> to vector<15x90xf32>
    %32 = vector.shape_cast %3 : vector<90xf32> to vector<1x90xf32>
    %33 = vector.broadcast %32 : vector<1x90xf32> to vector<15x90xf32>
    %34 = arith.mulf %31, %33 : vector<15x90xf32>
    %35 = arith.addf %29, %34 : vector<15x90xf32>
    %36 = vector.shape_cast %1 : vector<90xf32> to vector<1x90xf32>
    %37 = vector.broadcast %36 : vector<1x90xf32> to vector<15x90xf32>
    %38 = arith.mulf %31, %37 : vector<15x90xf32>
    %39 = arith.addf %21, %38 : vector<15x90xf32>
    %c0_22 = arith.constant 0 : index
    %c4_23 = arith.constant 4 : index
    %c0_24 = arith.constant 0 : index
    %c0_25 = arith.constant 0 : index
    %40 = vector.load %arg1[%c0_22, %c4_23, %c0_24, %c0_25] : memref<1x8x16x90xf32, #tpu.memory_space<vmem>>, vector<1x1x15x90xf32>
    %41 = vector.shape_cast %40 : vector<1x1x15x90xf32> to vector<15x90xf32>
    %42 = vector.shape_cast %5 : vector<90xf32> to vector<1x90xf32>
    %43 = vector.broadcast %42 : vector<1x90xf32> to vector<15x90xf32>
    %44 = arith.mulf %41, %43 : vector<15x90xf32>
    %45 = arith.addf %35, %44 : vector<15x90xf32>
    %46 = vector.shape_cast %3 : vector<90xf32> to vector<1x90xf32>
    %47 = vector.broadcast %46 : vector<1x90xf32> to vector<15x90xf32>
    %48 = arith.mulf %41, %47 : vector<15x90xf32>
    %49 = arith.addf %39, %48 : vector<15x90xf32>
    %c0_26 = arith.constant 0 : index
    %c6_27 = arith.constant 6 : index
    %c0_28 = arith.constant 0 : index
    %c0_29 = arith.constant 0 : index
    %50 = vector.load %arg1[%c0_26, %c6_27, %c0_28, %c0_29] : memref<1x8x16x90xf32, #tpu.memory_space<vmem>>, vector<1x1x15x90xf32>
    %51 = vector.shape_cast %50 : vector<1x1x15x90xf32> to vector<15x90xf32>
    %52 = vector.shape_cast %5 : vector<90xf32> to vector<1x90xf32>
    %53 = vector.broadcast %52 : vector<1x90xf32> to vector<15x90xf32>
    %54 = arith.mulf %51, %53 : vector<15x90xf32>
    %55 = arith.addf %49, %54 : vector<15x90xf32>
    %c0_30 = arith.constant 0 : index
    %c1_31 = arith.constant 1 : index
    %c0_32 = arith.constant 0 : index
    %c0_33 = arith.constant 0 : index
    %56 = vector.load %arg1[%c0_30, %c1_31, %c0_32, %c0_33] : memref<1x8x16x90xf32, #tpu.memory_space<vmem>>, vector<1x1x15x90xf32>
    %57 = vector.shape_cast %56 : vector<1x1x15x90xf32> to vector<15x90xf32>
    %58 = vector.shape_cast %7 : vector<90xf32> to vector<1x90xf32>
    %59 = vector.broadcast %58 : vector<1x90xf32> to vector<15x90xf32>
    %60 = arith.mulf %57, %59 : vector<15x90xf32>
    %61 = arith.addf %45, %60 : vector<15x90xf32>
    %62 = vector.shape_cast %1 : vector<90xf32> to vector<1x90xf32>
    %63 = vector.broadcast %62 : vector<1x90xf32> to vector<15x90xf32>
    %64 = arith.mulf %57, %63 : vector<15x90xf32>
    %65 = arith.addf %22, %64 : vector<15x90xf32>
    %c0_34 = arith.constant 0 : index
    %c3_35 = arith.constant 3 : index
    %c0_36 = arith.constant 0 : index
    %c0_37 = arith.constant 0 : index
    %66 = vector.load %arg1[%c0_34, %c3_35, %c0_36, %c0_37] : memref<1x8x16x90xf32, #tpu.memory_space<vmem>>, vector<1x1x15x90xf32>
    %67 = vector.shape_cast %66 : vector<1x1x15x90xf32> to vector<15x90xf32>
    %68 = vector.shape_cast %9 : vector<90xf32> to vector<1x90xf32>
    %69 = vector.broadcast %68 : vector<1x90xf32> to vector<15x90xf32>
    %70 = arith.mulf %67, %69 : vector<15x90xf32>
    %71 = arith.addf %61, %70 : vector<15x90xf32>
    %72 = vector.shape_cast %7 : vector<90xf32> to vector<1x90xf32>
    %73 = vector.broadcast %72 : vector<1x90xf32> to vector<15x90xf32>
    %74 = arith.mulf %67, %73 : vector<15x90xf32>
    %75 = arith.addf %55, %74 : vector<15x90xf32>
    %76 = vector.shape_cast %3 : vector<90xf32> to vector<1x90xf32>
    %77 = vector.broadcast %76 : vector<1x90xf32> to vector<15x90xf32>
    %78 = arith.mulf %67, %77 : vector<15x90xf32>
    %79 = arith.addf %65, %78 : vector<15x90xf32>
    %80 = vector.shape_cast %1 : vector<90xf32> to vector<1x90xf32>
    %81 = vector.broadcast %80 : vector<1x90xf32> to vector<15x90xf32>
    %82 = arith.mulf %67, %81 : vector<15x90xf32>
    %83 = arith.addf %23, %82 : vector<15x90xf32>
    %c0_38 = arith.constant 0 : index
    %c5_39 = arith.constant 5 : index
    %c0_40 = arith.constant 0 : index
    %c0_41 = arith.constant 0 : index
    %84 = vector.load %arg1[%c0_38, %c5_39, %c0_40, %c0_41] : memref<1x8x16x90xf32, #tpu.memory_space<vmem>>, vector<1x1x15x90xf32>
    %85 = vector.shape_cast %84 : vector<1x1x15x90xf32> to vector<15x90xf32>
    %86 = vector.shape_cast %11 : vector<90xf32> to vector<1x90xf32>
    %87 = vector.broadcast %86 : vector<1x90xf32> to vector<15x90xf32>
    %88 = arith.mulf %85, %87 : vector<15x90xf32>
    %89 = arith.addf %71, %88 : vector<15x90xf32>
    %90 = vector.shape_cast %9 : vector<90xf32> to vector<1x90xf32>
    %91 = vector.broadcast %90 : vector<1x90xf32> to vector<15x90xf32>
    %92 = arith.mulf %85, %91 : vector<15x90xf32>
    %93 = arith.addf %75, %92 : vector<15x90xf32>
    %94 = vector.shape_cast %5 : vector<90xf32> to vector<1x90xf32>
    %95 = vector.broadcast %94 : vector<1x90xf32> to vector<15x90xf32>
    %96 = arith.mulf %85, %95 : vector<15x90xf32>
    %97 = arith.addf %79, %96 : vector<15x90xf32>
    %98 = vector.shape_cast %3 : vector<90xf32> to vector<1x90xf32>
    %99 = vector.broadcast %98 : vector<1x90xf32> to vector<15x90xf32>
    %100 = arith.mulf %85, %99 : vector<15x90xf32>
    %101 = arith.addf %83, %100 : vector<15x90xf32>
    %c0_42 = arith.constant 0 : index
    %c7_43 = arith.constant 7 : index
    %c0_44 = arith.constant 0 : index
    %c0_45 = arith.constant 0 : index
    %102 = vector.load %arg1[%c0_42, %c7_43, %c0_44, %c0_45] : memref<1x8x16x90xf32, #tpu.memory_space<vmem>>, vector<1x1x15x90xf32>
    %103 = vector.shape_cast %102 : vector<1x1x15x90xf32> to vector<15x90xf32>
    %104 = vector.shape_cast %11 : vector<90xf32> to vector<1x90xf32>
    %105 = vector.broadcast %104 : vector<1x90xf32> to vector<15x90xf32>
    %106 = arith.mulf %103, %105 : vector<15x90xf32>
    %107 = arith.addf %93, %106 : vector<15x90xf32>
    %108 = vector.shape_cast %5 : vector<90xf32> to vector<1x90xf32>
    %109 = vector.broadcast %108 : vector<1x90xf32> to vector<15x90xf32>
    %110 = arith.mulf %103, %109 : vector<15x90xf32>
    %111 = arith.addf %101, %110 : vector<15x90xf32>
    %c0_46 = arith.constant 0 : index
    %c0_47 = arith.constant 0 : index
    %c1_48 = arith.constant 1 : index
    %c0_49 = arith.constant 0 : index
    %112 = vector.load %arg1[%c0_46, %c0_47, %c1_48, %c0_49] : memref<1x8x16x90xf32, #tpu.memory_space<vmem>>, vector<1x1x15x90xf32>
    %113 = vector.shape_cast %112 : vector<1x1x15x90xf32> to vector<15x90xf32>
    %114 = vector.shape_cast %13 : vector<90xf32> to vector<1x90xf32>
    %115 = vector.broadcast %114 : vector<1x90xf32> to vector<15x90xf32>
    %116 = arith.mulf %113, %115 : vector<15x90xf32>
    %117 = arith.addf %89, %116 : vector<15x90xf32>
    %118 = vector.shape_cast %7 : vector<90xf32> to vector<1x90xf32>
    %119 = vector.broadcast %118 : vector<1x90xf32> to vector<15x90xf32>
    %120 = arith.mulf %113, %119 : vector<15x90xf32>
    %121 = arith.addf %97, %120 : vector<15x90xf32>
    %c0_50 = arith.constant 0 : index
    %c2_51 = arith.constant 2 : index
    %c1_52 = arith.constant 1 : index
    %c0_53 = arith.constant 0 : index
    %122 = vector.load %arg1[%c0_50, %c2_51, %c1_52, %c0_53] : memref<1x8x16x90xf32, #tpu.memory_space<vmem>>, vector<1x1x15x90xf32>
    %123 = vector.shape_cast %122 : vector<1x1x15x90xf32> to vector<15x90xf32>
    %124 = vector.shape_cast %15 : vector<90xf32> to vector<1x90xf32>
    %125 = vector.broadcast %124 : vector<1x90xf32> to vector<15x90xf32>
    %126 = arith.mulf %123, %125 : vector<15x90xf32>
    %127 = arith.addf %117, %126 : vector<15x90xf32>
    %128 = vector.shape_cast %13 : vector<90xf32> to vector<1x90xf32>
    %129 = vector.broadcast %128 : vector<1x90xf32> to vector<15x90xf32>
    %130 = arith.mulf %123, %129 : vector<15x90xf32>
    %131 = arith.addf %107, %130 : vector<15x90xf32>
    %132 = vector.shape_cast %9 : vector<90xf32> to vector<1x90xf32>
    %133 = vector.broadcast %132 : vector<1x90xf32> to vector<15x90xf32>
    %134 = arith.mulf %123, %133 : vector<15x90xf32>
    %135 = arith.addf %121, %134 : vector<15x90xf32>
    %136 = vector.shape_cast %7 : vector<90xf32> to vector<1x90xf32>
    %137 = vector.broadcast %136 : vector<1x90xf32> to vector<15x90xf32>
    %138 = arith.mulf %123, %137 : vector<15x90xf32>
    %139 = arith.addf %111, %138 : vector<15x90xf32>
    %c0_54 = arith.constant 0 : index
    %c4_55 = arith.constant 4 : index
    %c1_56 = arith.constant 1 : index
    %c0_57 = arith.constant 0 : index
    %140 = vector.load %arg1[%c0_54, %c4_55, %c1_56, %c0_57] : memref<1x8x16x90xf32, #tpu.memory_space<vmem>>, vector<1x1x15x90xf32>
    %141 = vector.shape_cast %140 : vector<1x1x15x90xf32> to vector<15x90xf32>
    %142 = vector.shape_cast %17 : vector<90xf32> to vector<1x90xf32>
    %143 = vector.broadcast %142 : vector<1x90xf32> to vector<15x90xf32>
    %144 = arith.mulf %141, %143 : vector<15x90xf32>
    %145 = arith.addf %127, %144 : vector<15x90xf32>
    %146 = vector.shape_cast %15 : vector<90xf32> to vector<1x90xf32>
    %147 = vector.broadcast %146 : vector<1x90xf32> to vector<15x90xf32>
    %148 = arith.mulf %141, %147 : vector<15x90xf32>
    %149 = arith.addf %131, %148 : vector<15x90xf32>
    %150 = vector.shape_cast %11 : vector<90xf32> to vector<1x90xf32>
    %151 = vector.broadcast %150 : vector<1x90xf32> to vector<15x90xf32>
    %152 = arith.mulf %141, %151 : vector<15x90xf32>
    %153 = arith.addf %135, %152 : vector<15x90xf32>
    %154 = vector.shape_cast %9 : vector<90xf32> to vector<1x90xf32>
    %155 = vector.broadcast %154 : vector<1x90xf32> to vector<15x90xf32>
    %156 = arith.mulf %141, %155 : vector<15x90xf32>
    %157 = arith.addf %139, %156 : vector<15x90xf32>
    %c0_58 = arith.constant 0 : index
    %c6_59 = arith.constant 6 : index
    %c1_60 = arith.constant 1 : index
    %c0_61 = arith.constant 0 : index
    %158 = vector.load %arg1[%c0_58, %c6_59, %c1_60, %c0_61] : memref<1x8x16x90xf32, #tpu.memory_space<vmem>>, vector<1x1x15x90xf32>
    %159 = vector.shape_cast %158 : vector<1x1x15x90xf32> to vector<15x90xf32>
    %160 = vector.shape_cast %17 : vector<90xf32> to vector<1x90xf32>
    %161 = vector.broadcast %160 : vector<1x90xf32> to vector<15x90xf32>
    %162 = arith.mulf %159, %161 : vector<15x90xf32>
    %163 = arith.addf %149, %162 : vector<15x90xf32>
    %164 = vector.shape_cast %11 : vector<90xf32> to vector<1x90xf32>
    %165 = vector.broadcast %164 : vector<1x90xf32> to vector<15x90xf32>
    %166 = arith.mulf %159, %165 : vector<15x90xf32>
    %167 = arith.addf %157, %166 : vector<15x90xf32>
    %c0_62 = arith.constant 0 : index
    %c1_63 = arith.constant 1 : index
    %c1_64 = arith.constant 1 : index
    %c0_65 = arith.constant 0 : index
    %168 = vector.load %arg1[%c0_62, %c1_63, %c1_64, %c0_65] : memref<1x8x16x90xf32, #tpu.memory_space<vmem>>, vector<1x1x15x90xf32>
    %169 = vector.shape_cast %168 : vector<1x1x15x90xf32> to vector<15x90xf32>
    %170 = vector.shape_cast %13 : vector<90xf32> to vector<1x90xf32>
    %171 = vector.broadcast %170 : vector<1x90xf32> to vector<15x90xf32>
    %172 = arith.mulf %169, %171 : vector<15x90xf32>
    %173 = arith.addf %153, %172 : vector<15x90xf32>
    %c0_66 = arith.constant 0 : index
    %c3_67 = arith.constant 3 : index
    %c1_68 = arith.constant 1 : index
    %c0_69 = arith.constant 0 : index
    %174 = vector.load %arg1[%c0_66, %c3_67, %c1_68, %c0_69] : memref<1x8x16x90xf32, #tpu.memory_space<vmem>>, vector<1x1x15x90xf32>
    %175 = vector.shape_cast %174 : vector<1x1x15x90xf32> to vector<15x90xf32>
    %176 = vector.shape_cast %15 : vector<90xf32> to vector<1x90xf32>
    %177 = vector.broadcast %176 : vector<1x90xf32> to vector<15x90xf32>
    %178 = arith.mulf %175, %177 : vector<15x90xf32>
    %179 = arith.addf %173, %178 : vector<15x90xf32>
    %180 = vector.shape_cast %13 : vector<90xf32> to vector<1x90xf32>
    %181 = vector.broadcast %180 : vector<1x90xf32> to vector<15x90xf32>
    %182 = arith.mulf %175, %181 : vector<15x90xf32>
    %183 = arith.addf %167, %182 : vector<15x90xf32>
    %c0_70 = arith.constant 0 : index
    %c5_71 = arith.constant 5 : index
    %c1_72 = arith.constant 1 : index
    %c0_73 = arith.constant 0 : index
    %184 = vector.load %arg1[%c0_70, %c5_71, %c1_72, %c0_73] : memref<1x8x16x90xf32, #tpu.memory_space<vmem>>, vector<1x1x15x90xf32>
    %185 = vector.shape_cast %184 : vector<1x1x15x90xf32> to vector<15x90xf32>
    %186 = vector.shape_cast %17 : vector<90xf32> to vector<1x90xf32>
    %187 = vector.broadcast %186 : vector<1x90xf32> to vector<15x90xf32>
    %188 = arith.mulf %185, %187 : vector<15x90xf32>
    %189 = arith.addf %179, %188 : vector<15x90xf32>
    %190 = vector.shape_cast %15 : vector<90xf32> to vector<1x90xf32>
    %191 = vector.broadcast %190 : vector<1x90xf32> to vector<15x90xf32>
    %192 = arith.mulf %185, %191 : vector<15x90xf32>
    %193 = arith.addf %183, %192 : vector<15x90xf32>
    %c0_74 = arith.constant 0 : index
    %c7_75 = arith.constant 7 : index
    %c1_76 = arith.constant 1 : index
    %c0_77 = arith.constant 0 : index
    %194 = vector.load %arg1[%c0_74, %c7_75, %c1_76, %c0_77] : memref<1x8x16x90xf32, #tpu.memory_space<vmem>>, vector<1x1x15x90xf32>
    %195 = vector.shape_cast %194 : vector<1x1x15x90xf32> to vector<15x90xf32>
    %196 = vector.shape_cast %17 : vector<90xf32> to vector<1x90xf32>
    %197 = vector.broadcast %196 : vector<1x90xf32> to vector<15x90xf32>
    %198 = arith.mulf %195, %197 : vector<15x90xf32>
    %199 = arith.addf %193, %198 : vector<15x90xf32>
    %200 = vector.shape_cast %19 : vector<90xf32> to vector<1x90xf32>
    %201 = vector.broadcast %200 : vector<1x90xf32> to vector<15x90xf32>
    %202 = arith.addf %145, %201 : vector<15x90xf32>
    %cst_78 = arith.constant 0.000000e+00 : f32
    %203 = vector.broadcast %cst_78 : f32 to vector<15x90xf32>
    %204 = arith.maximumf %202, %203 : vector<15x90xf32>
    %205 = vector.shape_cast %19 : vector<90xf32> to vector<1x90xf32>
    %206 = vector.broadcast %205 : vector<1x90xf32> to vector<15x90xf32>
    %207 = arith.addf %163, %206 : vector<15x90xf32>
    %cst_79 = arith.constant 0.000000e+00 : f32
    %208 = vector.broadcast %cst_79 : f32 to vector<15x90xf32>
    %209 = arith.maximumf %207, %208 : vector<15x90xf32>
    %210 = arith.maximumf %204, %209 : vector<15x90xf32>
    %211 = vector.shape_cast %19 : vector<90xf32> to vector<1x90xf32>
    %212 = vector.broadcast %211 : vector<1x90xf32> to vector<15x90xf32>
    %213 = arith.addf %189, %212 : vector<15x90xf32>
    %cst_80 = arith.constant 0.000000e+00 : f32
    %214 = vector.broadcast %cst_80 : f32 to vector<15x90xf32>
    %215 = arith.maximumf %213, %214 : vector<15x90xf32>
    %216 = arith.maximumf %210, %215 : vector<15x90xf32>
    %217 = vector.shape_cast %19 : vector<90xf32> to vector<1x90xf32>
    %218 = vector.broadcast %217 : vector<1x90xf32> to vector<15x90xf32>
    %219 = arith.addf %199, %218 : vector<15x90xf32>
    %cst_81 = arith.constant 0.000000e+00 : f32
    %220 = vector.broadcast %cst_81 : f32 to vector<15x90xf32>
    %221 = arith.maximumf %219, %220 : vector<15x90xf32>
    %222 = arith.maximumf %216, %221 : vector<15x90xf32>
    %cst_82 = arith.constant 0.000000e+00 : f32
    %223 = vector.broadcast %cst_82 : f32 to vector<10x90xf32>
    %224 = vector.extract_strided_slice %222 {offsets = [0, 0], sizes = [1, 90], strides = [1, 1]} : vector<15x90xf32> to vector<1x90xf32>
    %225 = vector.shape_cast %224 : vector<1x90xf32> to vector<90xf32>
    %c0_83 = arith.constant 0 : index
    %c0_84 = arith.constant 0 : index
    %c0_85 = arith.constant 0 : index
    %226 = vector.load %arg4[%c0_83, %c0_84, %c0_85] : memref<15x10x90xf32, #tpu.memory_space<vmem>>, vector<1x10x90xf32>
    %227 = vector.shape_cast %226 : vector<1x10x90xf32> to vector<10x90xf32>
    %228 = vector.shape_cast %225 : vector<90xf32> to vector<1x90xf32>
    %229 = vector.broadcast %228 : vector<1x90xf32> to vector<10x90xf32>
    %230 = arith.mulf %229, %227 : vector<10x90xf32>
    %231 = arith.addf %223, %230 : vector<10x90xf32>
    %232 = vector.extract_strided_slice %222 {offsets = [1, 0], sizes = [1, 90], strides = [1, 1]} : vector<15x90xf32> to vector<1x90xf32>
    %233 = vector.shape_cast %232 : vector<1x90xf32> to vector<90xf32>
    %c1_86 = arith.constant 1 : index
    %c0_87 = arith.constant 0 : index
    %c0_88 = arith.constant 0 : index
    %234 = vector.load %arg4[%c1_86, %c0_87, %c0_88] : memref<15x10x90xf32, #tpu.memory_space<vmem>>, vector<1x10x90xf32>
    %235 = vector.shape_cast %234 : vector<1x10x90xf32> to vector<10x90xf32>
    %236 = vector.shape_cast %233 : vector<90xf32> to vector<1x90xf32>
    %237 = vector.broadcast %236 : vector<1x90xf32> to vector<10x90xf32>
    %238 = arith.mulf %237, %235 : vector<10x90xf32>
    %239 = arith.addf %231, %238 : vector<10x90xf32>
    %240 = vector.extract_strided_slice %222 {offsets = [2, 0], sizes = [1, 90], strides = [1, 1]} : vector<15x90xf32> to vector<1x90xf32>
    %241 = vector.shape_cast %240 : vector<1x90xf32> to vector<90xf32>
    %c2_89 = arith.constant 2 : index
    %c0_90 = arith.constant 0 : index
    %c0_91 = arith.constant 0 : index
    %242 = vector.load %arg4[%c2_89, %c0_90, %c0_91] : memref<15x10x90xf32, #tpu.memory_space<vmem>>, vector<1x10x90xf32>
    %243 = vector.shape_cast %242 : vector<1x10x90xf32> to vector<10x90xf32>
    %244 = vector.shape_cast %241 : vector<90xf32> to vector<1x90xf32>
    %245 = vector.broadcast %244 : vector<1x90xf32> to vector<10x90xf32>
    %246 = arith.mulf %245, %243 : vector<10x90xf32>
    %247 = arith.addf %239, %246 : vector<10x90xf32>
    %248 = vector.extract_strided_slice %222 {offsets = [3, 0], sizes = [1, 90], strides = [1, 1]} : vector<15x90xf32> to vector<1x90xf32>
    %249 = vector.shape_cast %248 : vector<1x90xf32> to vector<90xf32>
    %c3_92 = arith.constant 3 : index
    %c0_93 = arith.constant 0 : index
    %c0_94 = arith.constant 0 : index
    %250 = vector.load %arg4[%c3_92, %c0_93, %c0_94] : memref<15x10x90xf32, #tpu.memory_space<vmem>>, vector<1x10x90xf32>
    %251 = vector.shape_cast %250 : vector<1x10x90xf32> to vector<10x90xf32>
    %252 = vector.shape_cast %249 : vector<90xf32> to vector<1x90xf32>
    %253 = vector.broadcast %252 : vector<1x90xf32> to vector<10x90xf32>
    %254 = arith.mulf %253, %251 : vector<10x90xf32>
    %255 = arith.addf %247, %254 : vector<10x90xf32>
    %256 = vector.extract_strided_slice %222 {offsets = [4, 0], sizes = [1, 90], strides = [1, 1]} : vector<15x90xf32> to vector<1x90xf32>
    %257 = vector.shape_cast %256 : vector<1x90xf32> to vector<90xf32>
    %c4_95 = arith.constant 4 : index
    %c0_96 = arith.constant 0 : index
    %c0_97 = arith.constant 0 : index
    %258 = vector.load %arg4[%c4_95, %c0_96, %c0_97] : memref<15x10x90xf32, #tpu.memory_space<vmem>>, vector<1x10x90xf32>
    %259 = vector.shape_cast %258 : vector<1x10x90xf32> to vector<10x90xf32>
    %260 = vector.shape_cast %257 : vector<90xf32> to vector<1x90xf32>
    %261 = vector.broadcast %260 : vector<1x90xf32> to vector<10x90xf32>
    %262 = arith.mulf %261, %259 : vector<10x90xf32>
    %263 = arith.addf %255, %262 : vector<10x90xf32>
    %264 = vector.extract_strided_slice %222 {offsets = [5, 0], sizes = [1, 90], strides = [1, 1]} : vector<15x90xf32> to vector<1x90xf32>
    %265 = vector.shape_cast %264 : vector<1x90xf32> to vector<90xf32>
    %c5_98 = arith.constant 5 : index
    %c0_99 = arith.constant 0 : index
    %c0_100 = arith.constant 0 : index
    %266 = vector.load %arg4[%c5_98, %c0_99, %c0_100] : memref<15x10x90xf32, #tpu.memory_space<vmem>>, vector<1x10x90xf32>
    %267 = vector.shape_cast %266 : vector<1x10x90xf32> to vector<10x90xf32>
    %268 = vector.shape_cast %265 : vector<90xf32> to vector<1x90xf32>
    %269 = vector.broadcast %268 : vector<1x90xf32> to vector<10x90xf32>
    %270 = arith.mulf %269, %267 : vector<10x90xf32>
    %271 = arith.addf %263, %270 : vector<10x90xf32>
    %272 = vector.extract_strided_slice %222 {offsets = [6, 0], sizes = [1, 90], strides = [1, 1]} : vector<15x90xf32> to vector<1x90xf32>
    %273 = vector.shape_cast %272 : vector<1x90xf32> to vector<90xf32>
    %c6_101 = arith.constant 6 : index
    %c0_102 = arith.constant 0 : index
    %c0_103 = arith.constant 0 : index
    %274 = vector.load %arg4[%c6_101, %c0_102, %c0_103] : memref<15x10x90xf32, #tpu.memory_space<vmem>>, vector<1x10x90xf32>
    %275 = vector.shape_cast %274 : vector<1x10x90xf32> to vector<10x90xf32>
    %276 = vector.shape_cast %273 : vector<90xf32> to vector<1x90xf32>
    %277 = vector.broadcast %276 : vector<1x90xf32> to vector<10x90xf32>
    %278 = arith.mulf %277, %275 : vector<10x90xf32>
    %279 = arith.addf %271, %278 : vector<10x90xf32>
    %280 = vector.extract_strided_slice %222 {offsets = [7, 0], sizes = [1, 90], strides = [1, 1]} : vector<15x90xf32> to vector<1x90xf32>
    %281 = vector.shape_cast %280 : vector<1x90xf32> to vector<90xf32>
    %c7_104 = arith.constant 7 : index
    %c0_105 = arith.constant 0 : index
    %c0_106 = arith.constant 0 : index
    %282 = vector.load %arg4[%c7_104, %c0_105, %c0_106] : memref<15x10x90xf32, #tpu.memory_space<vmem>>, vector<1x10x90xf32>
    %283 = vector.shape_cast %282 : vector<1x10x90xf32> to vector<10x90xf32>
    %284 = vector.shape_cast %281 : vector<90xf32> to vector<1x90xf32>
    %285 = vector.broadcast %284 : vector<1x90xf32> to vector<10x90xf32>
    %286 = arith.mulf %285, %283 : vector<10x90xf32>
    %287 = arith.addf %279, %286 : vector<10x90xf32>
    %288 = vector.extract_strided_slice %222 {offsets = [8, 0], sizes = [1, 90], strides = [1, 1]} : vector<15x90xf32> to vector<1x90xf32>
    %289 = vector.shape_cast %288 : vector<1x90xf32> to vector<90xf32>
    %c8_107 = arith.constant 8 : index
    %c0_108 = arith.constant 0 : index
    %c0_109 = arith.constant 0 : index
    %290 = vector.load %arg4[%c8_107, %c0_108, %c0_109] : memref<15x10x90xf32, #tpu.memory_space<vmem>>, vector<1x10x90xf32>
    %291 = vector.shape_cast %290 : vector<1x10x90xf32> to vector<10x90xf32>
    %292 = vector.shape_cast %289 : vector<90xf32> to vector<1x90xf32>
    %293 = vector.broadcast %292 : vector<1x90xf32> to vector<10x90xf32>
    %294 = arith.mulf %293, %291 : vector<10x90xf32>
    %295 = arith.addf %287, %294 : vector<10x90xf32>
    %296 = vector.extract_strided_slice %222 {offsets = [9, 0], sizes = [1, 90], strides = [1, 1]} : vector<15x90xf32> to vector<1x90xf32>
    %297 = vector.shape_cast %296 : vector<1x90xf32> to vector<90xf32>
    %c9 = arith.constant 9 : index
    %c0_110 = arith.constant 0 : index
    %c0_111 = arith.constant 0 : index
    %298 = vector.load %arg4[%c9, %c0_110, %c0_111] : memref<15x10x90xf32, #tpu.memory_space<vmem>>, vector<1x10x90xf32>
    %299 = vector.shape_cast %298 : vector<1x10x90xf32> to vector<10x90xf32>
    %300 = vector.shape_cast %297 : vector<90xf32> to vector<1x90xf32>
    %301 = vector.broadcast %300 : vector<1x90xf32> to vector<10x90xf32>
    %302 = arith.mulf %301, %299 : vector<10x90xf32>
    %303 = arith.addf %295, %302 : vector<10x90xf32>
    %304 = vector.extract_strided_slice %222 {offsets = [10, 0], sizes = [1, 90], strides = [1, 1]} : vector<15x90xf32> to vector<1x90xf32>
    %305 = vector.shape_cast %304 : vector<1x90xf32> to vector<90xf32>
    %c10 = arith.constant 10 : index
    %c0_112 = arith.constant 0 : index
    %c0_113 = arith.constant 0 : index
    %306 = vector.load %arg4[%c10, %c0_112, %c0_113] : memref<15x10x90xf32, #tpu.memory_space<vmem>>, vector<1x10x90xf32>
    %307 = vector.shape_cast %306 : vector<1x10x90xf32> to vector<10x90xf32>
    %308 = vector.shape_cast %305 : vector<90xf32> to vector<1x90xf32>
    %309 = vector.broadcast %308 : vector<1x90xf32> to vector<10x90xf32>
    %310 = arith.mulf %309, %307 : vector<10x90xf32>
    %311 = arith.addf %303, %310 : vector<10x90xf32>
    %312 = vector.extract_strided_slice %222 {offsets = [11, 0], sizes = [1, 90], strides = [1, 1]} : vector<15x90xf32> to vector<1x90xf32>
    %313 = vector.shape_cast %312 : vector<1x90xf32> to vector<90xf32>
    %c11 = arith.constant 11 : index
    %c0_114 = arith.constant 0 : index
    %c0_115 = arith.constant 0 : index
    %314 = vector.load %arg4[%c11, %c0_114, %c0_115] : memref<15x10x90xf32, #tpu.memory_space<vmem>>, vector<1x10x90xf32>
    %315 = vector.shape_cast %314 : vector<1x10x90xf32> to vector<10x90xf32>
    %316 = vector.shape_cast %313 : vector<90xf32> to vector<1x90xf32>
    %317 = vector.broadcast %316 : vector<1x90xf32> to vector<10x90xf32>
    %318 = arith.mulf %317, %315 : vector<10x90xf32>
    %319 = arith.addf %311, %318 : vector<10x90xf32>
    %320 = vector.extract_strided_slice %222 {offsets = [12, 0], sizes = [1, 90], strides = [1, 1]} : vector<15x90xf32> to vector<1x90xf32>
    %321 = vector.shape_cast %320 : vector<1x90xf32> to vector<90xf32>
    %c12 = arith.constant 12 : index
    %c0_116 = arith.constant 0 : index
    %c0_117 = arith.constant 0 : index
    %322 = vector.load %arg4[%c12, %c0_116, %c0_117] : memref<15x10x90xf32, #tpu.memory_space<vmem>>, vector<1x10x90xf32>
    %323 = vector.shape_cast %322 : vector<1x10x90xf32> to vector<10x90xf32>
    %324 = vector.shape_cast %321 : vector<90xf32> to vector<1x90xf32>
    %325 = vector.broadcast %324 : vector<1x90xf32> to vector<10x90xf32>
    %326 = arith.mulf %325, %323 : vector<10x90xf32>
    %327 = arith.addf %319, %326 : vector<10x90xf32>
    %328 = vector.extract_strided_slice %222 {offsets = [13, 0], sizes = [1, 90], strides = [1, 1]} : vector<15x90xf32> to vector<1x90xf32>
    %329 = vector.shape_cast %328 : vector<1x90xf32> to vector<90xf32>
    %c13 = arith.constant 13 : index
    %c0_118 = arith.constant 0 : index
    %c0_119 = arith.constant 0 : index
    %330 = vector.load %arg4[%c13, %c0_118, %c0_119] : memref<15x10x90xf32, #tpu.memory_space<vmem>>, vector<1x10x90xf32>
    %331 = vector.shape_cast %330 : vector<1x10x90xf32> to vector<10x90xf32>
    %332 = vector.shape_cast %329 : vector<90xf32> to vector<1x90xf32>
    %333 = vector.broadcast %332 : vector<1x90xf32> to vector<10x90xf32>
    %334 = arith.mulf %333, %331 : vector<10x90xf32>
    %335 = arith.addf %327, %334 : vector<10x90xf32>
    %336 = vector.extract_strided_slice %222 {offsets = [14, 0], sizes = [1, 90], strides = [1, 1]} : vector<15x90xf32> to vector<1x90xf32>
    %337 = vector.shape_cast %336 : vector<1x90xf32> to vector<90xf32>
    %c14 = arith.constant 14 : index
    %c0_120 = arith.constant 0 : index
    %c0_121 = arith.constant 0 : index
    %338 = vector.load %arg4[%c14, %c0_120, %c0_121] : memref<15x10x90xf32, #tpu.memory_space<vmem>>, vector<1x10x90xf32>
    %339 = vector.shape_cast %338 : vector<1x10x90xf32> to vector<10x90xf32>
    %340 = vector.shape_cast %337 : vector<90xf32> to vector<1x90xf32>
    %341 = vector.broadcast %340 : vector<1x90xf32> to vector<10x90xf32>
    %342 = arith.mulf %341, %339 : vector<10x90xf32>
    %343 = arith.addf %335, %342 : vector<10x90xf32>
    %cst_122 = arith.constant dense<0.000000e+00> : vector<10xf32>
    %344 = vector.multi_reduction <add>, %343, %cst_122 [1] : vector<10x90xf32> to vector<10xf32>
    %c0_123 = arith.constant 0 : index
    %c0_124 = arith.constant 0 : index
    %345 = vector.load %arg5[%c0_123, %c0_124] : memref<1x10xf32, #tpu.memory_space<vmem>>, vector<1x10xf32>
    %346 = vector.shape_cast %345 : vector<1x10xf32> to vector<10xf32>
    %347 = arith.addf %344, %346 : vector<10xf32>
    %c0_125 = arith.constant 0 : index
    %c0_126 = arith.constant 0 : index
    %c0_127 = arith.constant 0 : index
    %348 = vector.load %arg6[%c0_125, %c0_126, %c0_127] : memref<1x1x10xf32, #tpu.memory_space<vmem>>, vector<1x1x10xf32>
    %349 = vector.shape_cast %348 : vector<1x1x10xf32> to vector<10xf32>
    %350 = vector.shape_cast %347 : vector<10xf32> to vector<1x1x10xf32>
    tpu.vector_store %arg6[%c0_125, %c0_126, %c0_127], %350 {strides = array<i32>} : memref<1x1x10xf32, #tpu.memory_space<vmem>>, vector<1x1x10xf32>,
    return
  }
  func.func @transform_0(%arg0: i32) -> (i32, i32, i32, i32) {
    %c0_i32 = arith.constant 0 : i32
    %c0_i32_0 = arith.constant 0 : i32
    %c0_i32_1 = arith.constant 0 : i32
    %c0_i32_2 = arith.constant 0 : i32
    return %arg0, %c0_i32, %c0_i32_0, %c0_i32_1 : i32, i32, i32, i32
  }
  func.func @transform_1(%arg0: i32) -> (i32, i32) {
    %c0_i32 = arith.constant 0 : i32
    %c0_i32_0 = arith.constant 0 : i32
    %c0_i32_1 = arith.constant 0 : i32
    return %c0_i32, %c0_i32_0 : i32, i32
  }
  func.func @transform_2(%arg0: i32) -> (i32, i32) {
    %c0_i32 = arith.constant 0 : i32
    %c0_i32_0 = arith.constant 0 : i32
    %c0_i32_1 = arith.constant 0 : i32
    return %c0_i32, %c0_i32_0 : i32, i32
  }
  func.func @transform_3(%arg0: i32) -> (i32, i32, i32) {
    %c0_i32 = arith.constant 0 : i32
    %c0_i32_0 = arith.constant 0 : i32
    %c0_i32_1 = arith.constant 0 : i32
    %c0_i32_2 = arith.constant 0 : i32
    return %c0_i32, %c0_i32_0, %c0_i32_1 : i32, i32, i32
  }
  func.func @transform_4(%arg0: i32) -> (i32, i32) {
    %c0_i32 = arith.constant 0 : i32
    %c0_i32_0 = arith.constant 0 : i32
    %c0_i32_1 = arith.constant 0 : i32
    return %c0_i32, %c0_i32_0 : i32, i32
  }
  func.func @transform_5(%arg0: i32) -> (i32, i32, i32) {
    %c0_i32 = arith.constant 0 : i32
    %c0_i32_0 = arith.constant 0 : i32
    %c0_i32_1 = arith.constant 0 : i32
    return %arg0, %c0_i32, %c0_i32_0 : i32, i32, i32
  }
}

</mosaic_0001>

<bundles_post_ra>
// kernel: net_forward.1
= control target key start
LH: loop header
LB: loop body
LE: loop exit
PB: predicated region body
PF: predicated region fallthrough
CT: control target
= control target key end

     0   :  { %10 = vsyncpa [#allocation3], 0  ;;  %s1350_s0 = inlined_call_operand.vmem [shape: f32[2,8,16,90], index: 0, kind: input, shape index: {}]   ;;  %s1351_s1 = inlined_call_operand.vmem [shape: f32[9,90], index: 1, kind: input, shape index: {}]   ;;  %s1352_s2 = inlined_call_operand.vmem [shape: f32[1,90], index: 2, kind: input, shape index: {}]   ;;  %s1353_s3 = inlined_call_operand.vmem [shape: f32[15,10,90], index: 3, kind: input, shape index: {}]   ;;  %s1354_s4 = inlined_call_operand.vmem [shape: f32[1,10], index: 4, kind: input, shape index: {}]   ;;  %s1355_s5 = inlined_call_operand.hbm [shape: f32[2,1,10], index: 5, kind: output, shape index: {}]  }
   0x1   :  { %12 = vsyncpa [#allocation3 + $0x1], 0  ;;  %s975_s18 = smov 0   ;;  %s977_s19 = smov 0  }
   0x2   :  { %s979_s20 = smov 0   ;;  %s981_s21 = smov 0  }
   0x3 LB: > { %s996_s22 = sadd.s32 4294967295, %s941_s21   ;;  %s760_s23 = sadd.s32 4294967294, %s941_s21   ;;  %s941_s21 = sphi %s981_s21, %s1361_s21   ;;  %s937_s20 = sphi %s979_s20, %s1360_s20   ;;  %s933_s19 = sphi %s977_s19, %s1359_s19   ;;  %s929_s18 = sphi %s975_s18, %s1358_s18  }
   0x4   : > { %s1000_s24 = sadd.s32 1, %s941_s21   ;;  %s135_s25 = sadd.s32 1, %s937_s20 }
   0x5   : > { %s132_s26 = ssub.s32 %s941_s21, %s1000_s24  ;;  %p145_p0 = scmp.ne.s32.totalorder %s937_s20, %s933_s19 }
   0x6   : > { %p133_p1 = scmp.eq.s32.totalorder %s132_s26, 0  ;;  %p146_p2 = scmp.eq.s32.totalorder %s996_s22, 1 }
   0x7   : > { %p151_p3 = scmp.ne.s32.totalorder %s933_s19, %s929_s18  ;;  %p152_p4 = scmp.eq.s32.totalorder %s760_s23, 1 }
   0x8   : > { %s1011_s27 = scalar_select %p133_p1, %s937_s20, %s135_s25  }
   0x9   : > { %p1013_p5 = por %p146_p2, %p145_p0  ;;  %p1017_p6 = por %p152_p4, %p151_p3 }
   0xa   : > { %p763_p7 = scmp.ge.s32.totalorder %s941_s21, 1  ;;  %p190_p8 = scmp.lt.s32.totalorder %s941_s21, 3 }
   0xc   : > { %p191_p9 = pnand %p763_p7, %p190_p8 }
   0xd   : > { %p217_p10 = scmp.lt.s32.totalorder (!%p191_p9), %s996_s22, 1  ;;  %v766_v0 = vld [vmem:[%s1351_s1] ss:$0 sm:$0xff] (!%p191_p9)  ;;  %v1031_v1 = vld [vmem:[%s1351_s1 + $0x1] ss:$0 sm:$0xff] (!%p191_p9)  ;;  %v481_v7 = vlaneseq (!%p191_p9)  ;;  %vm643_vm0 = vcmask (!%p191_p9), 736256  }
   0xe   : > { %194 = sbr.rel (%p191_p9) target bundleno = 396 (0x18c), region = 40  ;;  %v1041_v2 = vld [vmem:[%s1351_s1 + $0x2] ss:$0 sm:$0xff] (!%p191_p9)  ;;  %v1046_v3 = vld [vmem:[%s1351_s1 + $0x3] ss:$0 sm:$0xff] (!%p191_p9)  ;;  %vm647_vm1 = vcmask (!%p191_p9), 730112  }
   0xf   : > { %v1064_v22 = vld [vmem:[%s1351_s1 + $0x4] ss:$0 sm:$0xff] (!%p191_p9)  ;;  %v1081_v46 = vld [vmem:[%s1351_s1 + $0x5] ss:$0 sm:$0xff] (!%p191_p9)  ;;  %s215_s12 = sand.u32 (!%p191_p9), 1, %s933_s19   ;;  %s833_s14 = sshll.u32 (!%p191_p9), %s996_s22, 4 }
  0x10   : > { %s216_s15 = scalar_lea.vmem (!%p191_p9), [#allocation2], %s215_s12  ;;  %vm687_vm2 = vcmask (!%p191_p9), 130112   ;;  %vm690_vm3 = vcmask (!%p191_p9), 73728   ;;  %s1308_s23 = scalar_lea.hbm (!%p191_p9), %s1355_s5, %s833_s14 }
  0x11   : > { %s705_s16 = sshll.u32 (!%p191_p9), %s216_s15, 4  ;;  %s944_s26 = smov (!%p191_p9), [#allocation2]   ;;  %s1310_s16 = int_to_ptr.vmem [resolvable:$true] %s705_s16 }
  0x12   : > { %s879_s25 = scalar_lea.vmem (!%p191_p9), %s1310_s16, 16 }
  0x13   : > { %p880_p11 = scmp.ne.s32.totalorder (!%p191_p9), %s1310_s16, %s879_s25 }
  0x15   : > { %s218_s30 = scalar_select %p217_p10, %s996_s22, 1 }
  0x16   : > { %s693_s22 = scalar_lea.sflag [#allocation3], %s215_s12  ;;  %p881_p12 = pnand %p880_p11, %p1013_p5 }
  0x17   : > { %s836_s6 = sshll.u32 %s218_s30, 7  ;;  %s883_s30 = sshll.u32 %s944_s26, 4  ;;  %s884_s30 = int_to_ptr.vmem [resolvable:$false] %s883_s30 }
  0x18   : > { %s1036_s13 = scalar_lea.vmem %s1350_s0, %s836_s6  ;;  %p882_p13 = pneg %p881_p12 }
  0x19   : > { %v232_v4 = vld [vmem:[%s1036_s13] sm:$0xff]  ;;  %v233_v5 = vld [vmem:[%s1036_s13 + $0x8] sm:$0x7f]  ;;  %v775_v21 = vld [vmem:[%s1036_s13 + $0x10] sm:$0xff]  ;;  %s885_s6 = scalar_lea.vmem %s884_s30, 32  ;;  %p886_p0 = scmp.lt.s32.totalorder %s1310_s16, %s884_s30 }
  0x1a   : > { %v767_v6 = vld [vmem:[%s1036_s13 + $0x20] sm:$0xff]  ;;  %v238_v8 = vmul.f32 %v766_v0, %v232_v4  ;;  %v239_v9 = vmul.f32 %v766_v0, %v233_v5  ;;  %v768_v10 = vld [vmem:[%s1036_s13 + $0x28] sm:$0x7f]  ;;  %v776_v27 = vld [vmem:[%s1036_s13 + $0x18] sm:$0x7f]  ;;  %v286_v30 = vmul.f32 %v1046_v3, %v775_v21  ;;  %v290_v35 = vmul.f32 %v775_v21, %v766_v0  ;;  %p887_p1 = scmp.lt.s32.totalorder %s885_s6, %s879_s25 }
  0x1b   : > { %v249_v11 = vmul.f32 %v1031_v1, %v767_v6  ;;  %v253_v12 = vmul.f32 %v767_v6, %v766_v0  ;;  %v770_v13 = vld [vmem:[%s1036_s13 + $0x40] sm:$0xff]  ;;  %v771_v14 = vld [vmem:[%s1036_s13 + $0x48] sm:$0x7f]  ;;  %v250_v15 = vmul.f32 %v1031_v1, %v768_v10  ;;  %v254_v16 = vmul.f32 %v768_v10, %v766_v0  ;;  %v778_v36 = vld [vmem:[%s1036_s13 + $0x30] sm:$0xff] }
  0x1c   : > { %v264_v17 = vmul.f32 %v1041_v2, %v770_v13  ;;  %v265_v18 = vmul.f32 %v1041_v2, %v771_v14  ;;  %v773_v19 = vld [vmem:[%s1036_s13 + $0x60] sm:$0xff]  ;;  %v774_v20 = vld [vmem:[%s1036_s13 + $0x68] sm:$0x7f]  ;;  %v268_v24 = vmul.f32 %v770_v13, %v1031_v1  ;;  %v269_v25 = vmul.f32 %v771_v14, %v1031_v1  ;;  %v779_v37 = vld [vmem:[%s1036_s13 + $0x38] sm:$0x7f]  ;;  %p888_p2 = por %p887_p1, %p886_p0 }
  0x1d   : > { %v251_v23 = vadd.f32 %v249_v11, %v238_v8  ;;  %v275_v26 = vmul.f32 %v773_v19, %v1041_v2  ;;  %v252_v28 = vadd.f32 %v250_v15, %v239_v9  ;;  %v276_v29 = vmul.f32 %v774_v20, %v1041_v2  ;;  %v781_v55 = vld [vmem:[%s1036_s13 + $0x50] sm:$0xff]  ;;  %v782_v56 = vld [vmem:[%s1036_s13 + $0x58] sm:$0x7f]  ;;  %v1101_v11 = vld [vmem:[%s1351_s1 + $0x6] ss:$0 sm:$0xff] }
  0x1e   : > { %v287_v31 = vmul.f32 %v1046_v3, %v776_v27  ;;  %v270_v33 = vadd.f32 %v268_v24, %v253_v12  ;;  %v271_v34 = vadd.f32 %v269_v25, %v254_v16  ;;  %v291_v39 = vmul.f32 %v776_v27, %v766_v0  ;;  %v784_v9 = vld [vmem:[%s1036_s13 + $0x70] sm:$0xff]  ;;  %v785_v10 = vld [vmem:[%s1036_s13 + $0x78] sm:$0x7f]  ;;  %v351_v16 = vld [vmem:[%s1036_s13 + $0x1] sm:$0xff]  ;;  %p889_p3 = pnand %p888_p2, %p882_p13 }
  0x1f   : > { %v266_v32 = vadd.f32 %v264_v17, %v251_v23  ;;  %v267_v38 = vadd.f32 %v265_v18, %v252_v28  ;;  %v301_v40 = vmul.f32 %v1064_v22, %v778_v36  ;;  %v302_v41 = vmul.f32 %v1064_v22, %v779_v37  ;;  %v352_v17 = vld [vmem:[%s1036_s13 + $0x9] sm:$0x7f] }
  0x20   : > { %v277_v42 = vadd.f32 %v275_v26, %v270_v33  ;;  %v278_v43 = vadd.f32 %v276_v29, %v271_v34  ;;  %v305_v45 = vmul.f32 %v778_v36, %v1046_v3  ;;  %v306_v48 = vmul.f32 %v779_v37, %v1046_v3  ;;  %v1112_v26 = vld [vmem:[%s1351_s1 + $0x7] ss:$0 sm:$0xff] }
  0x21   : > { %v288_v44 = vadd.f32 %v286_v30, %v266_v32  ;;  %v289_v47 = vadd.f32 %v287_v31, %v267_v38  ;;  %v309_v49 = vmul.f32 %v778_v36, %v1031_v1  ;;  %v310_v50 = vmul.f32 %v779_v37, %v1031_v1 }
  0x22   : > { %v307_v52 = vadd.f32 %v305_v45, %v277_v42  ;;  %v313_v53 = vmul.f32 %v778_v36, %v766_v0  ;;  %v314_v54 = vmul.f32 %v779_v37, %v766_v0  ;;  %v308_v58 = vadd.f32 %v306_v48, %v278_v43  ;;  %v788_v36 = vld [vmem:[%s1036_s13 + $0x29] sm:$0x7f]  ;;  %v1130_v45 = vld [vmem:[%s1351_s1 + $0x8] ss:$0 sm:$0xff] }
  0x23   : > { %v303_v51 = vadd.f32 %v301_v40, %v288_v44  ;;  %v304_v57 = vadd.f32 %v302_v41, %v289_v47  ;;  %v311_v59 = vadd.f32 %v309_v49, %v290_v35  ;;  %v312_v60 = vadd.f32 %v310_v50, %v291_v39  ;;  %v787_v35 = vld [vmem:[%s1036_s13 + $0x21] sm:$0xff]  ;;  %v832_v40 = vld [vmem:[%s1354_s4] ss:$0 sm:$0xff] }
  0x24   : > { %v324_v61 = vmul.f32 %v1081_v46, %v781_v55  ;;  %v325_v62 = vmul.f32 %v1081_v46, %v782_v56  ;;  %v328_v63 = vmul.f32 %v781_v55, %v1064_v22  ;;  %v329_v4 = vmul.f32 %v782_v56, %v1064_v22  ;;  %658 = vbcast.lane.b32.xlu1 %v832_v40, 256 }
  0x25   : > { %v332_v5 = vmul.f32 %v781_v55, %v1041_v2  ;;  %v333_v0 = vmul.f32 %v782_v56, %v1041_v2  ;;  %v336_v6 = vmul.f32 %v781_v55, %v1031_v1  ;;  %v337_v8 = vmul.f32 %v782_v56, %v1031_v1  ;;  %v790_v55 = vld [vmem:[%s1036_s13 + $0x41] sm:$0xff]  ;;  %v791_v56 = vld [vmem:[%s1036_s13 + $0x49] sm:$0x7f] }
  0x26   : > { %v326_v12 = vadd.f32 %v324_v61, %v303_v51  ;;  %v327_v13 = vadd.f32 %v325_v62, %v304_v57  ;;  %v330_v14 = vadd.f32 %v328_v63, %v307_v52  ;;  %v331_v15 = vadd.f32 %v329_v4, %v308_v58 }
  0x27   : > { %v334_v18 = vadd.f32 %v332_v5, %v311_v59  ;;  %v335_v19 = vadd.f32 %v333_v0, %v312_v60  ;;  %v338_v20 = vadd.f32 %v336_v6, %v313_v53  ;;  %v339_v21 = vadd.f32 %v337_v8, %v314_v54  ;;  %v793_v8 = vld [vmem:[%s1036_s13 + $0x61] sm:$0xff] }
  0x28   : > { %v343_v1 = vmul.f32 %v784_v9, %v1081_v46  ;;  %v344_v23 = vmul.f32 %v785_v10, %v1081_v46  ;;  %v347_v24 = vmul.f32 %v784_v9, %v1041_v2  ;;  %v348_v25 = vmul.f32 %v785_v10, %v1041_v2  ;;  %662 = vbcast.lane.b32.xlu1 %v832_v40, 264  ;;  %v794_v9 = vld [vmem:[%s1036_s13 + $0x69] sm:$0x7f]  ;;  %v795_v10 = vld [vmem:[%s1036_s13 + $0x11] sm:$0xff] }
  0x29   : > { %v357_v27 = vmul.f32 %v1101_v11, %v351_v16  ;;  %v358_v28 = vmul.f32 %v1101_v11, %v352_v17  ;;  %v361_v29 = vmul.f32 %v1046_v3, %v351_v16  ;;  %v362_v30 = vmul.f32 %v1046_v3, %v352_v17  ;;  %v796_v16 = vld [vmem:[%s1036_s13 + $0x19] sm:$0x7f]  ;;  %v797_v17 = vld [vmem:[%s1036_s13 + $0x31] sm:$0xff] }
  0x2a   : > { %v345_v31 = vadd.f32 %v343_v1, %v330_v14  ;;  %v346_v32 = vadd.f32 %v344_v23, %v331_v15  ;;  %v349_v33 = vadd.f32 %v347_v24, %v338_v20  ;;  %v350_v34 = vadd.f32 %v348_v25, %v339_v21  ;;  %v801_v40 = vld [vmem:[%s1036_s13 + $0x71] sm:$0xff] }
  0x2b   : > { %v359_v2 = vadd.f32 %v357_v27, %v326_v12  ;;  %v360_v37 = vadd.f32 %v358_v28, %v327_v13  ;;  %v363_v38 = vadd.f32 %v361_v29, %v334_v18  ;;  %v364_v39 = vadd.f32 %v362_v30, %v335_v19  ;;  %v798_v18 = vld [vmem:[%s1036_s13 + $0x39] sm:$0x7f] }
  0x2c   : > { %v371_v41 = vmul.f32 %v1112_v26, %v787_v35  ;;  %v372_v42 = vmul.f32 %v1112_v26, %v788_v36  ;;  %v375_v43 = vmul.f32 %v787_v35, %v1101_v11  ;;  %v376_v44 = vmul.f32 %v788_v36, %v1101_v11 }
  0x2d   : > { %v379_v47 = vmul.f32 %v787_v35, %v1064_v22  ;;  %v380_v48 = vmul.f32 %v788_v36, %v1064_v22  ;;  %v383_v49 = vmul.f32 %v787_v35, %v1046_v3  ;;  %v384_v50 = vmul.f32 %v788_v36, %v1046_v3 }
  0x2e   : > { %v373_v51 = vadd.f32 %v371_v41, %v359_v2  ;;  %v374_v52 = vadd.f32 %v372_v42, %v360_v37  ;;  %v377_v53 = vadd.f32 %v375_v43, %v345_v31  ;;  %v378_v54 = vadd.f32 %v376_v44, %v346_v32  ;;  %v799_v31 = vld [vmem:[%s1036_s13 + $0x51] sm:$0xff]  ;;  %v800_v32 = vld [vmem:[%s1036_s13 + $0x59] sm:$0x7f] }
  0x2f   : > { %v381_v57 = vadd.f32 %v379_v47, %v363_v38  ;;  %v382_v58 = vadd.f32 %v380_v48, %v364_v39  ;;  %v385_v59 = vadd.f32 %v383_v49, %v349_v33  ;;  %v386_v60 = vadd.f32 %v384_v50, %v350_v34  ;;  %v802_v41 = vld [vmem:[%s1036_s13 + $0x79] sm:$0x7f] }
  0x30   : > { %v393_v61 = vmul.f32 %v1130_v45, %v790_v55  ;;  %v394_v62 = vmul.f32 %v1130_v45, %v791_v56  ;;  %v397_v3 = vmul.f32 %v790_v55, %v1112_v26  ;;  %v398_v63 = vmul.f32 %v791_v56, %v1112_v26 }
  0x31   : > { %v401_v4 = vmul.f32 %v790_v55, %v1081_v46  ;;  %v402_v5 = vmul.f32 %v791_v56, %v1081_v46  ;;  %v405_v0 = vmul.f32 %v790_v55, %v1064_v22  ;;  %v406_v6 = vmul.f32 %v791_v56, %v1064_v22 }
  0x32   : > { %v395_v12 = vadd.f32 %v393_v61, %v373_v51  ;;  %v396_v13 = vadd.f32 %v394_v62, %v374_v52  ;;  %v399_v14 = vadd.f32 %v397_v3, %v377_v53  ;;  %v400_v15 = vadd.f32 %v398_v63, %v378_v54 }
  0x33   : > { %v403_v19 = vadd.f32 %v401_v4, %v381_v57  ;;  %v404_v20 = vadd.f32 %v402_v5, %v382_v58  ;;  %v407_v21 = vadd.f32 %v405_v0, %v385_v59  ;;  %v408_v1 = vadd.f32 %v406_v6, %v386_v60 }
  0x34   : > { %v411_v23 = vmul.f32 %v793_v8, %v1130_v45  ;;  %v412_v22 = vmul.f32 %v794_v9, %v1130_v45  ;;  %v415_v24 = vmul.f32 %v793_v8, %v1081_v46  ;;  %v416_v25 = vmul.f32 %v794_v9, %v1081_v46  ;;  %v803_v46 = vld [vmem:[%s1352_s2] ss:$0 sm:$0xff] }
  0x35   : > { %v421_v27 = vmul.f32 %v795_v10, %v1101_v11  ;;  %v422_v28 = vmul.f32 %v796_v16, %v1101_v11  ;;  %v427_v29 = vmul.f32 %v797_v17, %v1112_v26  ;;  %v428_v30 = vmul.f32 %v798_v18, %v1112_v26 }
  0x36   : > { %v413_v33 = vadd.f32 %v411_v23, %v399_v14  ;;  %v414_v34 = vadd.f32 %v412_v22, %v400_v15  ;;  %v417_v35 = vadd.f32 %v415_v24, %v407_v21  ;;  %v418_v36 = vadd.f32 %v416_v25, %v408_v1  ;;  %v479_v1 = vld [vmem:[%s1353_s3] sm:$0xff]  ;;  %v480_v23 = vld [vmem:[%s1353_s3 + $0x8] sm:$0x3]  ;;  %v804_v22 = vld [vmem:[%s1353_s3 + $0x10] sm:$0xff] }
  0x37   : > { %v423_v2 = vadd.f32 %v421_v27, %v403_v19  ;;  %v424_v37 = vadd.f32 %v422_v28, %v404_v20  ;;  %v431_v38 = vmul.f32 %v797_v17, %v1101_v11  ;;  %v432_v39 = vmul.f32 %v798_v18, %v1101_v11  ;;  %v805_v24 = vld [vmem:[%s1353_s3 + $0x18] sm:$0x3] }
  0x38   : > { %v437_v42 = vmul.f32 %v799_v31, %v1130_v45  ;;  %v438_v43 = vmul.f32 %v800_v32, %v1130_v45  ;;  %v441_v44 = vmul.f32 %v799_v31, %v1112_v26  ;;  %v442_v47 = vmul.f32 %v800_v32, %v1112_v26 }
  0x39   : > { %v429_v48 = vadd.f32 %v427_v29, %v423_v2  ;;  %v430_v49 = vadd.f32 %v428_v30, %v424_v37  ;;  %v433_v50 = vadd.f32 %v431_v38, %v417_v35  ;;  %v434_v51 = vadd.f32 %v432_v39, %v418_v36  ;;  %v806_v29 = vld [vmem:[%s1353_s3 + $0x20] sm:$0xff]  ;;  %v807_v30 = vld [vmem:[%s1353_s3 + $0x28] sm:$0x3]  ;;  %v808_v35 = vld [vmem:[%s1353_s3 + $0x30] sm:$0xff] }
  0x3a   : > { %v447_v52 = vmul.f32 %v801_v40, %v1130_v45  ;;  %v448_v53 = vmul.f32 %v802_v41, %v1130_v45  ;;  %v457_v54 = vadd.f32 %v803_v46, %v395_v12  ;;  %v458_v11 = vadd.f32 %v803_v46, %v396_v13  ;;  %v809_v36 = vld [vmem:[%s1353_s3 + $0x38] sm:$0x3] }
  0x3b   : > { %v439_v55 = vadd.f32 %v437_v42, %v429_v48  ;;  %v440_v56 = vadd.f32 %v438_v43, %v430_v49  ;;  %v443_v57 = vadd.f32 %v441_v44, %v433_v50  ;;  %v444_v58 = vadd.f32 %v442_v47, %v434_v51  ;;  %v810_v43 = vld [vmem:[%s1353_s3 + $0x40] sm:$0xff]  ;;  %v811_v44 = vld [vmem:[%s1353_s3 + $0x48] sm:$0x3] }
  0x3c   : > { %v459_v59 = vmax.f32 %v457_v54, 0.0  ;;  %v461_v60 = vadd.f32 %v803_v46, %v413_v33  ;;  %v462_v61 = vadd.f32 %v803_v46, %v414_v34  ;;  %v1176_v26 = vshrl.u32 %v481_v7, 7  ;;  %v812_v54 = vld [vmem:[%s1353_s3 + $0x50] sm:$0xff] }
  0x3d   : > { %v449_v62 = vadd.f32 %v447_v52, %v443_v57  ;;  %v467_v3 = vadd.f32 %v803_v46, %v439_v55  ;;  %v450_v63 = vadd.f32 %v448_v53, %v444_v58  ;;  %v460_v4 = vmax.f32 %v458_v11, 0.0  ;;  %v813_v11 = vld [vmem:[%s1353_s3 + $0x58] sm:$0x3] }
  0x3e   : > { %v463_v5 = vmax.f32 %v461_v60, 0.0  ;;  %v464_v0 = vmax.f32 %v462_v61, 0.0  ;;  %v468_v6 = vadd.f32 %v803_v46, %v440_v56  ;;  %v483_v12 = vsub.s32 0, %v1176_v26  ;;  %v814_v60 = vld [vmem:[%s1353_s3 + $0x60] sm:$0xff]  ;;  %v815_v61 = vld [vmem:[%s1353_s3 + $0x68] sm:$0x3] }
  0x3f   : > { %v469_v45 = vmax.f32 %v467_v3, 0.0  ;;  %v473_v8 = vadd.f32 %v803_v46, %v449_v62  ;;  %v494_v14 = vsub.s32 1, %v1176_v26  ;;  %v505_v15 = vsub.s32 2, %v1176_v26 }
  0x40   : > { %v465_v9 = vmax.f32 %v459_v59, %v463_v5  ;;  %v516_v16 = vsub.s32 3, %v1176_v26  ;;  %v466_v17 = vmax.f32 %v460_v4, %v464_v0  ;;  %v470_v18 = vmax.f32 %v468_v6, 0.0  ;;  %v816_v0 = vld [vmem:[%s1353_s3 + $0x70] sm:$0xff] }
  0x41   : > { %v475_v10 = vmax.f32 %v473_v8, 0.0  ;;  %v474_v19 = vadd.f32 %v803_v46, %v450_v63  ;;  %v527_v20 = vsub.s32 4, %v1176_v26  ;;  %v538_v25 = vsub.s32 5, %v1176_v26 }
  0x42   : > { %v471_v13 = vmax.f32 %v465_v9, %v469_v45  ;;  %v472_v33 = vmax.f32 %v466_v17, %v470_v18  ;;  %v549_v2 = vsub.s32 6, %v1176_v26  ;;  %v560_v48 = vsub.s32 7, %v1176_v26  ;;  %v817_v45 = vld [vmem:[%s1353_s3 + $0x78] sm:$0x3]  ;;  %v818_v18 = vld [vmem:[%s1353_s3 + $0x80] sm:$0xff] }
  0x43   : > { %v476_v34 = vmax.f32 %v474_v19, 0.0  ;;  %v819_v19 = vld [vmem:[%s1353_s3 + $0x88] sm:$0x3] }
  0x44   : > { %v477_v21 = vmax.f32 %v471_v13, %v475_v10 }
  0x45   : > { %v478_v53 = vmax.f32 %v472_v33, %v476_v34  ;;  %v823_v33 = vld [vmem:[%s1353_s3 + $0xa8] sm:$0x3] }
  0x46   : > { %v484_v27 = vrot.slane %v477_v21, %v483_v12  ;;  %v495_v28 = vrot.slane %v477_v21, %v494_v14  ;;  %v506_v31 = vrot.slane %v477_v21, %v505_v15  ;;  %v517_v32 = vrot.slane %v477_v21, %v516_v16 }
  0x47   : > { %v528_v46 = vrot.slane %v477_v21, %v527_v20  ;;  %v539_v47 = vrot.slane %v477_v21, %v538_v25  ;;  %v550_v55 = vrot.slane %v477_v21, %v549_v2  ;;  %v561_v62 = vrot.slane %v477_v21, %v560_v48 }
  0x48   : > { %v485_v37 = vmul.f32 %v484_v27, %v479_v1  ;;  %v486_v38 = vmul.f32 %v484_v27, %v480_v23  ;;  %v496_v39 = vmul.f32 %v804_v22, %v495_v28  ;;  %v497_v40 = vmul.f32 %v805_v24, %v495_v28  ;;  %v820_v24 = vld [vmem:[%s1353_s3 + $0x90] sm:$0xff]  ;;  %v821_v27 = vld [vmem:[%s1353_s3 + $0x98] sm:$0x3] }
  0x49   : > { %v507_v41 = vmul.f32 %v806_v29, %v506_v31  ;;  %v508_v42 = vmul.f32 %v807_v30, %v506_v31  ;;  %v518_v51 = vmul.f32 %v808_v35, %v517_v32  ;;  %v519_v52 = vmul.f32 %v809_v36, %v517_v32  ;;  %v822_v32 = vld [vmem:[%s1353_s3 + $0xa0] sm:$0xff] }
  0x4a   : > { %v498_v49 = vadd.f32 %v496_v39, %v485_v37  ;;  %v499_v50 = vadd.f32 %v497_v40, %v486_v38  ;;  %v529_v58 = vmul.f32 %v810_v43, %v528_v46  ;;  %v530_v59 = vmul.f32 %v811_v44, %v528_v46  ;;  %v824_v46 = vld [vmem:[%s1353_s3 + $0xb0] sm:$0xff]  ;;  %v825_v38 = vld [vmem:[%s1353_s3 + $0xb8] sm:$0x3]  ;;  %v826_v40 = vld [vmem:[%s1353_s3 + $0xc0] sm:$0xff] }
  0x4b   : > { %v540_v4 = vmul.f32 %v812_v54, %v539_v47  ;;  %v541_v5 = vmul.f32 %v813_v11, %v539_v47  ;;  %v551_v6 = vmul.f32 %v814_v60, %v550_v55  ;;  %v552_v10 = vmul.f32 %v815_v61, %v550_v55  ;;  %v827_v44 = vld [vmem:[%s1353_s3 + $0xc8] sm:$0x3] }
  0x4c   : > { %v509_v56 = vadd.f32 %v507_v41, %v498_v49  ;;  %v510_v57 = vadd.f32 %v508_v42, %v499_v50  ;;  %v572_v13 = vrot.slane %v478_v53, %v483_v12  ;;  %v562_v17 = vmul.f32 %v816_v0, %v561_v62 }
  0x4d   : > { %v563_v23 = vmul.f32 %v817_v45, %v561_v62  ;;  %v583_v22 = vrot.slane %v478_v53, %v494_v14  ;;  %v594_v12 = vrot.slane %v478_v53, %v505_v15  ;;  %v605_v14 = vrot.slane %v478_v53, %v516_v16 }
  0x4e   : > { %v520_v3 = vadd.f32 %v518_v51, %v509_v56  ;;  %v521_v63 = vadd.f32 %v519_v52, %v510_v57  ;;  %v573_v30 = vmul.f32 %v818_v18, %v572_v13  ;;  %v574_v31 = vmul.f32 %v819_v19, %v572_v13  ;;  %v828_v51 = vld [vmem:[%s1353_s3 + $0xd0] sm:$0xff]  ;;  %v829_v52 = vld [vmem:[%s1353_s3 + $0xd8] sm:$0x3]  ;;  %v830_v56 = vld [vmem:[%s1353_s3 + $0xe0] sm:$0xff] }
  0x4f   : > { %v584_v35 = vmul.f32 %v820_v24, %v583_v22  ;;  %v585_v36 = vmul.f32 %v821_v27, %v583_v22  ;;  %v616_v37 = vrot.slane %v478_v53, %v527_v20  ;;  %v595_v39 = vmul.f32 %v822_v32, %v594_v12  ;;  %v831_v57 = vld [vmem:[%s1353_s3 + $0xe8] sm:$0x3] }
  0x50   : > { %v531_v8 = vadd.f32 %v529_v58, %v520_v3  ;;  %v532_v9 = vadd.f32 %v530_v59, %v521_v63  ;;  %v596_v42 = vmul.f32 %v823_v33, %v594_v12  ;;  %v627_v43 = vrot.slane %v478_v53, %v538_v25 }
  0x51   : > { %v606_v47 = vmul.f32 %v824_v46, %v605_v14  ;;  %v607_v49 = vmul.f32 %v825_v38, %v605_v14  ;;  %v617_v50 = vmul.f32 %v826_v40, %v616_v37  ;;  %v638_v25 = vrot.slane %v478_v53, %v549_v2 }
  0x52   : > { %v542_v21 = vadd.f32 %v540_v4, %v531_v8  ;;  %v543_v1 = vadd.f32 %v541_v5, %v532_v9  ;;  %v618_v55 = vmul.f32 %v827_v44, %v616_v37  ;;  %v628_v59 = vmul.f32 %v828_v51, %v627_v43 }
  0x53   : > { %v629_v61 = vmul.f32 %v829_v52, %v627_v43  ;;  %v639_v3 = vmul.f32 %v830_v56, %v638_v25  ;;  %v640_v4 = vmul.f32 %v831_v57, %v638_v25  ;;  %v943_v8 = vmov 0  }
  0x54   : > { %v553_v28 = vadd.f32 %v551_v6, %v542_v21  ;;  %v554_v29 = vadd.f32 %v552_v10, %v543_v1  ;;  %877 = vset.pattern.permute.xlu0 %v943_v8  ;;  %878 = vset.pattern.permute.xlu1 %v943_v8  ;;  %v677_v21 = vand.u32 127, %v481_v7 }
  0x56   : > { %v564_v15 = vadd.f32 %v562_v17, %v553_v28  ;;  %v565_v34 = vadd.f32 %v563_v23, %v554_v29  ;;  %v682_v1 = vadd.s32 4294967288, %v677_v21  ;;  %v680_v23 = vsub.s32 %v677_v21, %v1176_v26 }
  0x58   : > { %v575_v16 = vadd.f32 %v573_v30, %v564_v15  ;;  %v576_v41 = vadd.f32 %v574_v31, %v565_v34  ;;  %v685_v22 = vsub.s32 %v682_v1, %v1176_v26 }
  0x5a   : > { %v586_v20 = vadd.f32 %v584_v35, %v575_v16  ;;  %v587_v48 = vadd.f32 %v585_v36, %v576_v41 }
  0x5c   : > { %v597_v54 = vadd.f32 %v595_v39, %v586_v20  ;;  %v598_v11 = vadd.f32 %v596_v42, %v587_v48 }
  0x5e   : > { %v608_v58 = vadd.f32 %v606_v47, %v597_v54  ;;  %v609_v60 = vadd.f32 %v607_v49, %v598_v11 }
  0x60   : > { %v619_v62 = vadd.f32 %v617_v50, %v608_v58  ;;  %v620_v63 = vadd.f32 %v618_v55, %v609_v60 }
  0x62   : > { %v630_v5 = vadd.f32 %v628_v59, %v619_v62  ;;  %v631_v2 = vadd.f32 %v629_v61, %v620_v63 }
  0x64   : > { %v641_v53 = vadd.f32 %v639_v3, %v630_v5  ;;  %v642_v0 = vadd.f32 %v640_v4, %v631_v2 }
  0x66   : > { %v644_v6 = vsel %vm643_vm0, %v641_v53, 0.0  ;;  %v648_v45 = vsel %vm647_vm1, %v642_v0, 0.0 }
  0x67   : > { %645 = vadd.xlane.f32.xlu0 %v644_v6 }
  0x6b   : > { %649 = vadd.xlane.f32.xlu0 %v648_v45 }
  0x96   : > { %v659_v9 = vpop.permute.xlu1 %658 }
  0x9a   : > { %v663_v17 = vpop.permute.xlu1 %662 }
  0xf4   : > { %v646_v10 = vpop.xlane.xlu0 %645 }
  0xf5   : > { %v666_v13 = vadd.f32 %v659_v9, %v646_v10 }
  0xf7   : > { %671 = vperm.xlu0 %877, %v666_v13  }
  0xf8   : > { %v650_v18 = vpop.xlane.xlu0 %649 }
  0xf9   : > { %v667_v19 = vadd.f32 %v663_v17, %v650_v18 }
  0xfb   : > { %674 = vperm.xlu1 %878, %v667_v19  }
 0x176   : > { %v672_v24 = vpop.permute.xlu0 %671 }
 0x177   : > { %v681_v27 = vrot.slane %v672_v24, %v680_v23 }
 0x17a   : > { %v675_v12 = vpop.permute.xlu1 %674 }
 0x17b   : > { %v686_v28 = vrot.slane %v675_v12, %v685_v22 }
 0x17d   : > { %v688_v7 = vsel %vm687_vm2, %v686_v28, %v681_v27 }
 0x17e   : > { %691 = vst.msk [vmem:[%s216_s15] sm:$0x1] %vm690_vm3, %v688_v7 }
 0x17f   : > { %892 = shalt.err (!%p889_p3)
}
 0x180   : > { %s893_s7 = scalar_lea.hbm %s1308_s23, 16  ;;  %s897_s10 = scalar_lea.hbm %s1355_s5, 32 }
 0x181   : > { %p894_p4 = scmp.ne.s32.totalorder %s1308_s23, %s893_s7  ;;  %p898_p9 = scmp.lt.u32.totalorder %s1308_s23, %s1355_s5 }
 0x182   : > { %p899_p10 = scmp.lt.u32.totalorder %s897_s10, %s893_s7  ;;  %p901_p12 = scmp.lt.u32.totalorder %s893_s7, %s1308_s23 }
 0x183   : > { %p895_p7 = pnand %p894_p4, %p1013_p5 }
 0x184   : > { %p900_p11 = por %p899_p10, %p898_p9 }
 0x185   : > { %p896_p8 = pneg %p895_p7 }
 0x186   : > { %p902_p13 = por %p901_p12, %p900_p11 }
 0x188   : > { %p903_p0 = pnand %p902_p13, %p896_p8 }
 0x18a   : > { %906 = shalt.err (!%p903_p0)
}
 0x18b   : > { %837 = dma.vmem_to_hbm [thread:$0]  (%p1013_p5), %s1310_s16, 16, %s1308_s23, %s693_s22  }
 0x18c PF: > { %p843_p1 = scmp.ge.s32.totalorder %s941_s21, 2  ;;  %s717_s14 = sand.u32 1, %s929_s18  }
 0x18d   : > { %s718_s15 = scalar_lea.sflag [#allocation3], %s717_s14 }
 0x18e   : > { %p840_p2 = pnand %p843_p1, %p1017_p6 }
 0x190   : > { %924 = dma.done.wait (!%p840_p2), %s718_s15, 16  }
 0x191   : > { %926 = vsyncadd (!%p840_p2), %s718_s15, 4294967280  ;;  %p15_p3 = scmp.ge.s32.totalorder %s1000_s24, 4   ;;  %s1358_s18 = smov %s933_s19 }
 0x192   : > { %s1359_s19 = smov %s937_s20  ;;  %s1360_s20 = smov %s1011_s27 }
 0x193   : > { %s1361_s21 = smov %s1000_s24  ;;  %17 = sbr.rel (!%p15_p3) target bundleno = 3 (0x3), region = 96 }
 0x19a   :  { %722 = vsyncpa [#allocation3], 1 }
 0x19b   :  { %724 = vsyncpa [#allocation3 + $0x1], 1 }

</bundles_post_ra>
